<compile_context>
chip_gen: v5e
topology: v5e:2x2
jax: 0.10.0
libtpu: 0.0.40
codegen_flags: <defaults>
</compile_context>

<pallas_src>
import jax
import jax.numpy as jnp
from jax.experimental import pallas as pl
from jax.experimental.pallas import tpu as pltpu


# ---------------------------------------------------------------------------
# Fused kernel: input projections + liquid-tanh + (output proj ∘ lateral mix
# ∘ adaptation) as a single folded matmul.  One batch tile per grid step.
# ---------------------------------------------------------------------------
def _liquid_layer_kernel(x_ref, w_all_ref, b_all_ref, w_proj_ref, b_proj_ref,
                         out_ref):
    # All N input projections as one matmul: (TB, Din) @ (Din, N*L)
    z = jnp.dot(x_ref[...], w_all_ref[...],
                preferred_element_type=jnp.float32) + b_all_ref[...]

    # Liquid-tanh activation (elementwise; EUP transcendentals).
    a = jnp.tanh(z) + 0.1 * jnp.sin(0.5 * z) * jnp.cos(0.3 * z)

    # Output projection with lateral mix + adaptation + bias folded host-side.
    # Lane-dense store: Npad is a multiple of 128 (padded columns are zero).
    out_ref[...] = jnp.dot(a, w_proj_ref[...],
                           preferred_element_type=jnp.float32) + b_proj_ref[...]


def liquid_layer_forward(x, params, *, max_batch_tile=512):
    """Fused LiquidLayer forward.  x: (B, Din) -> (B, N)."""
    B, Din = x.shape
    N = params["w_lat"].shape[0]
    w_all = params["w_all"]                      # (Din, N*L)
    NL = w_all.shape[1]
    w_proj = params["w_proj_pad"]                # (N*L, Npad), Npad % 128 == 0
    Npad = w_proj.shape[1]

    # Pad batch up to the f32 sublane height (8) and to a whole number of tiles.
    b8 = max(8, -(-B // 8) * 8)
    tb = min(max_batch_tile, b8)
    b_pad = -(-b8 // tb) * tb
    if b_pad != B:
        x_pad = jnp.zeros((b_pad, Din), x.dtype).at[:B, :].set(x)
    else:
        x_pad = x

    vmem = pltpu.MemorySpace.VMEM
    out = pl.pallas_call(
        _liquid_layer_kernel,
        out_shape=jax.ShapeDtypeStruct((b_pad, Npad), jnp.float32),
        grid_spec=pltpu.PrefetchScalarGridSpec(
            num_scalar_prefetch=0,
            grid=(b_pad // tb,),
            in_specs=[
                # x: streamed per batch tile.
                pl.BlockSpec((tb, Din), lambda i: (i, 0), memory_space=vmem),
                # Weight slabs: constant index map -> DMA'd once, stay resident.
                pl.BlockSpec((Din, NL), lambda i: (0, 0), memory_space=vmem),
                pl.BlockSpec((1, NL), lambda i: (0, 0), memory_space=vmem),
                pl.BlockSpec((NL, Npad), lambda i: (0, 0), memory_space=vmem),
                pl.BlockSpec((1, Npad), lambda i: (0, 0), memory_space=vmem),
            ],
            out_specs=pl.BlockSpec((tb, Npad), lambda i: (i, 0),
                                   memory_space=vmem),
        ),
        compiler_params=pltpu.CompilerParams(
            dimension_semantics=("parallel",),           # batch tiles independent
            vmem_limit_bytes=32 * 1024 * 1024,           # fits v5e/v6e/v7x budgets
        ),
    )(x_pad, w_all, params["b_all"], w_proj, params["b_proj_pad"])

    return out[:B, :N]


# ---------------------------------------------------------------------------
# Deterministic parameter construction (synthetic; mirrors module shapes),
# plus host-side fusion of the per-neuron parameter slivers into dense slabs.
# ---------------------------------------------------------------------------
def make_params(key, batch, input_size, num_neurons, liquid_state_size,
                lateral_connectivity=0.3):
    N, Din, L = num_neurons, input_size, liquid_state_size
    ks = jax.random.split(key, 8)

    # Per-neuron Linear params (stored pre-transposed for x @ W form).
    w_in_t = jax.random.normal(ks[0], (N, Din, L), jnp.float32) * 0.1
    b_in = jax.random.normal(ks[1], (N, 1, L), jnp.float32) * 0.1
    w_liq_t = jax.random.normal(ks[2], (N, L, L), jnp.float32) * 0.1  # unused (h=0)
    b_liq = jax.random.normal(ks[3], (N, 1, L), jnp.float32) * 0.1
    w_out = jax.random.normal(ks[4], (N, L, 1), jnp.float32) * 0.1
    b_out = jax.random.normal(ks[5], (N, 1, 1), jnp.float32) * 0.1

    # Lateral weights: randn * 0.1, sparse mask, zero diagonal.
    w_lat = jax.random.normal(ks[6], (N, N), jnp.float32) * 0.1
    mask = (jax.random.uniform(ks[7], (N, N)) < lateral_connectivity)
    mask = mask & ~jnp.eye(N, dtype=bool)
    w_lat = w_lat * mask.astype(jnp.float32)
    adapt = jnp.ones((1, N), jnp.float32)

    # ---- host-side fusion into kernel-friendly slabs ----
    # (N, Din, L) -> (Din, N*L): columns [n*L:(n+1)*L] are neuron n's W_in^T.
    w_all = jnp.transpose(w_in_t, (1, 0, 2)).reshape(Din, N * L)
    # Fold b_liq into b_in (recurrent matmul is exactly zero for h = 0).
    b_all = (b_in + b_liq)[:, 0, :].reshape(1, N * L)

    # Fold output projection + lateral mix + adaptation + output bias:
    #   y = ((a @ Wb + b) @ (I + 0.1*W_lat)) * adapt = a @ W_proj + b_proj
    mix_adapt = (jnp.eye(N, dtype=jnp.float32) + 0.1 * w_lat) * adapt  # (N, N)
    # W_proj[n*L + l, j] = w_out[n, l] * mix_adapt[n, j]  (block-diag ∘ mix fold)
    w_proj = (w_out[:, :, 0][:, :, None] * mix_adapt[:, None, :]).reshape(N * L, N)
    b_proj = b_out[:, 0, 0][None, :] @ mix_adapt                        # (1, N)

    # Pad output width to a multiple of 128 lanes for unmasked (lane-dense) stores.
    n_pad = -(-N // 128) * 128
    w_proj_pad = jnp.zeros((N * L, n_pad), jnp.float32).at[:, :N].set(w_proj)
    b_proj_pad = jnp.zeros((1, n_pad), jnp.float32).at[:, :N].set(b_proj)

    return dict(
        # raw (kept for the reference path)
        w_in_t=w_in_t, b_in=b_in, w_liq_t=w_liq_t, b_liq=b_liq,
        w_out=w_out, b_out=b_out, w_lat=w_lat, adapt=adapt,
        # fused (kernel inputs)
        w_all=w_all, b_all=b_all,
        w_proj_pad=w_proj_pad, b_proj_pad=b_proj_pad,
        # fresh hidden states (reset_state -> zeros); reference only
        h=jnp.zeros((N, batch, L), jnp.float32),
    )


# ---------------------------------------------------------------------------
# Pure-JAX reference (mirrors the original per-neuron math) for correctness.
# ---------------------------------------------------------------------------
def reference_forward(x, p):
    z = (jnp.einsum("bd,ndl->nbl", x, p["w_in_t"])
         + jnp.einsum("nbl,nlm->nbm", p["h"], p["w_liq_t"])
         + p["b_in"] + p["b_liq"])
    a = jnp.tanh(z) + 0.1 * jnp.sin(0.5 * z) * jnp.cos(0.3 * z)
    o = jnp.einsum("nbl,nlo->nbo", a, p["w_out"]) + p["b_out"]   # (N, B, 1)
    layer_out = jnp.transpose(o[:, :, 0], (1, 0))                # (B, N)
    lateral = layer_out @ p["w_lat"]
    return (layer_out + 0.1 * lateral) * p["adapt"]


if __name__ == "__main__":
    batch, input_size, num_neurons, liquid_state_size = 2, 8, 4, 32

    key = jax.random.PRNGKey(0)
    k_x, k_p = jax.random.split(key)
    x = jax.random.normal(k_x, (batch, input_size), jnp.float32)
    params = make_params(k_p, batch, input_size, num_neurons,
                         liquid_state_size)

    out = liquid_layer_forward(x, params)
    out = jax.block_until_ready(out)

    ref = reference_forward(x, params)
    assert out.shape == (batch, num_neurons)
    assert jnp.allclose(out, ref, atol=5e-5, rtol=5e-5), "mismatch vs reference"

    print("KERNEL_OK")
</pallas_src>

<mosaic_0001>
module attributes {stable_mosaic.version = 11 : i64} {
  func.func @_liquid_layer_kernel(%arg0: i32, %arg1: memref<8x8xf32, #tpu.memory_space<vmem>>, %arg2: memref<8x128xf32, #tpu.memory_space<vmem>>, %arg3: memref<1x128xf32, #tpu.memory_space<vmem>>, %arg4: memref<128x128xf32, #tpu.memory_space<vmem>>, %arg5: memref<1x128xf32, #tpu.memory_space<vmem>>, %arg6: memref<8x128xf32, #tpu.memory_space<vmem>>) attributes {dimension_semantics = [#tpu.dimension_semantics<parallel>], iteration_bounds = array<i64: 1>, scalar_prefetch = 0 : i64, scratch_operands = 0 : i64, tpu.core_type = #tpu.core_type<tc>, window_params = [{transform_indices = @transform_0, window_bounds = array<i64: 8, 8>}, {pipeline_mode = #tpu.pipeline_mode<synchronous>, transform_indices = @transform_1, window_bounds = array<i64: 8, 128>}, {pipeline_mode = #tpu.pipeline_mode<synchronous>, transform_indices = @transform_2, window_bounds = array<i64: 1, 128>}, {pipeline_mode = #tpu.pipeline_mode<synchronous>, transform_indices = @transform_3, window_bounds = array<i64: 128, 128>}, {pipeline_mode = #tpu.pipeline_mode<synchronous>, transform_indices = @transform_4, window_bounds = array<i64: 1, 128>}, {transform_indices = @transform_5, window_bounds = array<i64: 8, 128>}]} {
    %c0 = arith.constant 0 : index
    %c0_0 = arith.constant 0 : index
    %0 = vector.load %arg1[%c0, %c0_0] : memref<8x8xf32, #tpu.memory_space<vmem>>, vector<8x8xf32>
    %c0_1 = arith.constant 0 : index
    %c0_2 = arith.constant 0 : index
    %1 = vector.load %arg2[%c0_1, %c0_2] : memref<8x128xf32, #tpu.memory_space<vmem>>, vector<8x128xf32>
    %cst = arith.constant dense<0.000000e+00> : vector<8x128xf32>
    %2 = tpu.matmul %0, %1, %cst {dimension_numbers = #tpu.dot_dimension_numbers<[1], [0], [0], [1], [0, 0, 1, 1], [], []>} : vector<8x8xf32>, vector<8x128xf32>, vector<8x128xf32> -> vector<8x128xf32>
    %c0_3 = arith.constant 0 : index
    %c0_4 = arith.constant 0 : index
    %3 = vector.load %arg3[%c0_3, %c0_4] : memref<1x128xf32, #tpu.memory_space<vmem>>, vector<1x128xf32>
    %4 = vector.broadcast %3 : vector<1x128xf32> to vector<8x128xf32>
    %5 = arith.addf %2, %4 : vector<8x128xf32>
    %6 = math.tanh %5 : vector<8x128xf32>
    %cst_5 = arith.constant 5.000000e-01 : f32
    %7 = vector.broadcast %cst_5 : f32 to vector<8x128xf32>
    %8 = arith.mulf %7, %5 : vector<8x128xf32>
    %9 = math.sin %8 : vector<8x128xf32>
    %cst_6 = arith.constant 1.000000e-01 : f32
    %10 = vector.broadcast %cst_6 : f32 to vector<8x128xf32>
    %11 = arith.mulf %10, %9 : vector<8x128xf32>
    %cst_7 = arith.constant 3.000000e-01 : f32
    %12 = vector.broadcast %cst_7 : f32 to vector<8x128xf32>
    %13 = arith.mulf %12, %5 : vector<8x128xf32>
    %14 = math.cos %13 : vector<8x128xf32>
    %15 = arith.mulf %11, %14 : vector<8x128xf32>
    %16 = arith.addf %6, %15 : vector<8x128xf32>
    %c0_8 = arith.constant 0 : index
    %c0_9 = arith.constant 0 : index
    %17 = vector.load %arg4[%c0_8, %c0_9] : memref<128x128xf32, #tpu.memory_space<vmem>>, vector<128x128xf32>
    %cst_10 = arith.constant dense<0.000000e+00> : vector<8x128xf32>
    %18 = tpu.matmul %16, %17, %cst_10 {dimension_numbers = #tpu.dot_dimension_numbers<[1], [0], [0], [1], [0, 0, 1, 1], [], []>} : vector<8x128xf32>, vector<128x128xf32>, vector<8x128xf32> -> vector<8x128xf32>
    %c0_11 = arith.constant 0 : index
    %c0_12 = arith.constant 0 : index
    %19 = vector.load %arg5[%c0_11, %c0_12] : memref<1x128xf32, #tpu.memory_space<vmem>>, vector<1x128xf32>
    %20 = vector.broadcast %19 : vector<1x128xf32> to vector<8x128xf32>
    %21 = arith.addf %18, %20 : vector<8x128xf32>
    %c0_13 = arith.constant 0 : index
    %c0_14 = arith.constant 0 : index
    %22 = vector.load %arg6[%c0_13, %c0_14] : memref<8x128xf32, #tpu.memory_space<vmem>>, vector<8x128xf32>
    tpu.vector_store %arg6[%c0_13, %c0_14], %21 {strides = array<i32>} : memref<8x128xf32, #tpu.memory_space<vmem>>, vector<8x128xf32>,
    return
  }
  func.func @transform_0(%arg0: i32) -> (i32, i32) {
    %c0_i32 = arith.constant 0 : i32
    %c0_i32_0 = arith.constant 0 : i32
    return %arg0, %c0_i32 : i32, i32
  }
  func.func @transform_1(%arg0: i32) -> (i32, i32) {
    %c0_i32 = arith.constant 0 : i32
    %c0_i32_0 = arith.constant 0 : i32
    %c0_i32_1 = arith.constant 0 : i32
    return %c0_i32, %c0_i32_0 : i32, i32
  }
  func.func @transform_2(%arg0: i32) -> (i32, i32) {
    %c0_i32 = arith.constant 0 : i32
    %c0_i32_0 = arith.constant 0 : i32
    %c0_i32_1 = arith.constant 0 : i32
    return %c0_i32, %c0_i32_0 : i32, i32
  }
  func.func @transform_3(%arg0: i32) -> (i32, i32) {
    %c0_i32 = arith.constant 0 : i32
    %c0_i32_0 = arith.constant 0 : i32
    %c0_i32_1 = arith.constant 0 : i32
    return %c0_i32, %c0_i32_0 : i32, i32
  }
  func.func @transform_4(%arg0: i32) -> (i32, i32) {
    %c0_i32 = arith.constant 0 : i32
    %c0_i32_0 = arith.constant 0 : i32
    %c0_i32_1 = arith.constant 0 : i32
    return %c0_i32, %c0_i32_0 : i32, i32
  }
  func.func @transform_5(%arg0: i32) -> (i32, i32) {
    %c0_i32 = arith.constant 0 : i32
    %c0_i32_0 = arith.constant 0 : i32
    return %arg0, %c0_i32 : i32, i32
  }
}

</mosaic_0001>

<bundles_post_ra>
// kernel: tpu_custom_call.1
= control target key start
LH: loop header
LB: loop body
LE: loop exit
PB: predicated region body
PF: predicated region fallthrough
CT: control target
= control target key end

     0   :  { %10 = vsyncpa [#allocation3], 0  ;;  %s849_s0 = inlined_call_operand.hbm [shape: f32[8,8], index: 0, kind: input, shape index: {}]   ;;  %s850_s1 = inlined_call_operand.hbm [shape: f32[8,128], index: 1, kind: input, shape index: {}]   ;;  %s851_s2 = inlined_call_operand.vmem [shape: f32[1,128], index: 2, kind: input, shape index: {}]   ;;  %s852_s3 = inlined_call_operand.hbm [shape: f32[128,128], index: 3, kind: input, shape index: {}]   ;;  %s853_s4 = inlined_call_operand.vmem [shape: f32[1,128], index: 4, kind: input, shape index: {}]   ;;  %s854_s5 = inlined_call_operand.hbm [shape: f32[8,128], index: 5, kind: output, shape index: {}]  }
   0x1   :  { %11 = vsyncpa [#allocation6], 0  ;;  %s29_s20 = sshll.u32 %s850_s1, 4  ;;  %s30_s20 = int_to_ptr.hbm [resolvable:$true] %s29_s20 }
   0x2   :  { %12 = vsyncpa [#allocation4], 0  ;;  %s594_s21 = smov [#allocation5]   ;;  %s18_s25 = sshll.u32 %s849_s0, 4  ;;  %s19_s25 = int_to_ptr.hbm [resolvable:$true] %s18_s25 }
   0x3   :  { %s31_s22 = sshll.u32 %s594_s21, 4  ;;  %s595_s26 = smov [#allocation2]   ;;  %s32_s22 = int_to_ptr.vmem [resolvable:$true] %s31_s22 }
   0x4   :  { %34 = dma.hbm_to_vmem [thread:$0]  %s30_s20, 128, %s32_s22, [#allocation6]  }
   0x5   :  { %s20_s27 = sshll.u32 %s595_s26, 4  ;;  %s41_s30 = sshll.u32 %s852_s3, 4  ;;  %s21_s27 = int_to_ptr.vmem [resolvable:$true] %s20_s27  ;;  %s42_s30 = int_to_ptr.hbm [resolvable:$true] %s41_s30 }
   0x6   :  { %23 = dma.hbm_to_vmem [thread:$0]  %s19_s25, 128, %s21_s27, [#allocation3]  }
   0x7   :  { %s596_s1 = smov [#allocation7]   ;;  %s597_s7 = smov 128  }
   0x8   :  { %s43_s6 = sshll.u32 %s596_s1, 4  ;;  %s598_s8 = smov 8   ;;  %s44_s6 = int_to_ptr.vmem [resolvable:$true] %s43_s6 }
   0x9   :  { %49 = dma.hbm_to_vmem [thread:$0]  %s42_s30, 2048, %s44_s6, [#allocation6], %s597_s7, %s597_s7, %s598_s8  }
   0xa   :  { %588 = dma.done.wait [#allocation3], 128  }
   0xb   :  { %589 = vsyncadd [#allocation3], 4294967168 }
   0xc   :  { %590 = dma.done.wait [#allocation6], 2176  }
   0xd   :  { %591 = vsyncadd [#allocation6], 4294965120  ;;  %vm70_vm0 = vcmask 64512   ;;  %v65_v0 = vld [vmem:[#allocation5] sm:$0xff]  ;;  %v64_v1 = vld [vmem:[#allocation2] sm:$0xff]  ;;  %s606_s10 = smov [#allocation8]  }
   0xe   :  { %89 = vmatpush.msra.mxu0 %v65_v0  ;;  %v424_v2 = vld [vmem:[#allocation7 + $0x78] sm:$0xff]  ;;  %v423_v3 = vld [vmem:[#allocation7 + $0x70] sm:$0xff]  ;;  %v422_v4 = vld [vmem:[#allocation7 + $0x68] sm:$0xff]  ;;  %v599_v42 = vmov 2102212464   ;;  %s455_s11 = sshll.u32 %s606_s10, 4  ;;  %s456_s11 = int_to_ptr.vmem [resolvable:$true] %s455_s11 }
   0xf   :  { %468 = vmatmul.msk.f32.vlgmr.msra.gmra.mxu0 %vm70_vm0, %v64_v1  ;;  %429 = vmatpush.msra.mxu1 %v424_v2  ;;  %v421_v5 = vld [vmem:[#allocation7 + $0x60] sm:$0xff]  ;;  %v488_v6 = vld [vmem:[%s851_s2] ss:$0 sm:$0xff]  ;;  %v420_v7 = vld [vmem:[#allocation7 + $0x58] sm:$0xff]  ;;  %v600_v48 = vmov 920167782  }
  0x10   :  { %v419_v9 = vld [vmem:[#allocation7 + $0x50] sm:$0xff]  ;;  %v418_v11 = vld [vmem:[#allocation7 + $0x48] sm:$0xff]  ;;  %v417_v14 = vld [vmem:[#allocation7 + $0x40] sm:$0xff]  ;;  %v601_v51 = vmov 1326507024   ;;  %s457_s14 = sshll.u32 %s854_s5, 4  ;;  %s458_s14 = int_to_ptr.hbm [resolvable:$true] %s457_s14 }
  0x11   :  { %430 = vmatpush.msra.mxu1 %v423_v3  ;;  %v416_v18 = vld [vmem:[#allocation7 + $0x38] sm:$0xff]  ;;  %v415_v23 = vld [vmem:[#allocation7 + $0x30] sm:$0xff]  ;;  %v414_v26 = vld [vmem:[#allocation7 + $0x28] sm:$0xff]  ;;  %v602_v56 = vmov 683565275  }
  0x12   :  { %v413_v31 = vld [vmem:[#allocation7 + $0x20] sm:$0xff]  ;;  %v412_v34 = vld [vmem:[#allocation7 + $0x18] sm:$0xff]  ;;  %v411_v40 = vld [vmem:[#allocation7 + $0x10] sm:$0xff]  ;;  %v603_v58 = vmov 2475754826  }
  0x13   :  { %431 = vmatpush.msra.mxu1 %v422_v4  ;;  %v410_v45 = vld [vmem:[#allocation7 + $0x8] sm:$0xff]  ;;  %v409_v55 = vld [vmem:[#allocation7] sm:$0xff]  ;;  %v604_v63 = vmov 2131351028  }
  0x15   :  { %432 = vmatpush.msra.mxu1 %v421_v5 }
  0x17   :  { %433 = vmatpush.msra.mxu1 %v420_v7 }
  0x19   :  { %434 = vmatpush.msra.mxu1 %v419_v9 }
  0x1b   :  { %435 = vmatpush.msra.mxu1 %v418_v11 }
  0x1d   :  { %436 = vmatpush.msra.mxu1 %v417_v14 }
  0x1f   :  { %437 = vmatpush.msra.mxu1 %v416_v18 }
  0x21   :  { %438 = vmatpush.msra.mxu1 %v415_v23 }
  0x23   :  { %439 = vmatpush.msra.mxu1 %v414_v26 }
  0x25   :  { %440 = vmatpush.msra.mxu1 %v413_v31 }
  0x27   :  { %441 = vmatpush.msra.mxu1 %v412_v34 }
  0x29   :  { %442 = vmatpush.msra.mxu1 %v411_v40 }
  0x2b   :  { %443 = vmatpush.msra.mxu1 %v410_v45 }
  0x2d   :  { %444 = vmatpush.msra.mxu1 %v409_v55 }
  0x8c   :  { %v91_v8 = vpop.f32.mrf.mxu0 }
  0x8d   :  { %v649_v10 = vadd.f32 %v488_v6, %v91_v8 }
  0x8f   :  { %v652_v12 = vmul.f32 0.5, %v649_v10  ;;  %v655_v13 = vmul.f32 0.3, %v649_v10  ;;  %490 = vtanh.f32 %v649_v10 }
  0x91   :  { %v99_v15 = vand.u32 2139095040, %v652_v12  ;;  %v256_v16 = vand.u32 2139095040, %v655_v13  ;;  %v96_v17 = vand.u32 2147483647, %v652_v12  ;;  %v253_v19 = vand.u32 2147483647, %v655_v13 }
  0x93   :  { %v100_v20 = vshrl.u32 %v99_v15, 23  ;;  %v257_v21 = vshrl.u32 %v256_v16, 23  ;;  %v103_v22 = vand.u32 8388607, %v96_v17  ;;  %v260_v28 = vand.u32 8388607, %v253_v19 }
  0x95   :  { %v469_v24 = vadd.s32 4294967169, %v100_v20  ;;  %v472_v25 = vadd.s32 4294967169, %v257_v21  ;;  %v104_v27 = vor.u32 8388608, %v103_v22  ;;  %v261_v36 = vor.u32 8388608, %v260_v28 }
  0x97   :  { %v106_v29 = vadd.s32 1, %v469_v24  ;;  %v263_v30 = vadd.s32 1, %v472_v25  ;;  %v665_v35 = vshll.u32 %v104_v27, 8  ;;  %v678_v47 = vshll.u32 %v261_v36, 8 }
  0x99   :  { %vm107_vm1 = vcmp.gt.s32.totalorder %v106_v29, 0  ;;  %vm264_vm2 = vcmp.gt.s32.totalorder %v263_v30, 0  ;;  %v676_v46 = vand.u32 65535, %v665_v35  ;;  %v146_v14 = vshrl.u32 %v665_v35, 16 }
  0x9a   :  { %v108_v32 = vsel %vm107_vm1, %v106_v29, 0  ;;  %v265_v33 = vsel %vm264_vm2, %v263_v30, 0 }
  0x9b   :  { %v667_v37 = vshrl.u32 %v108_v32, 5  ;;  %v110_v38 = vand.u32 31, %v108_v32  ;;  %v669_v39 = vand.u32 31, %v265_v33  ;;  %v694_v9 = vshrl.u32 %v265_v33, 5 }
  0x9d   :  { %v111_v41 = vsub.s32 32, %v110_v38  ;;  %v122_v43 = vshll.u32 %v599_v42, %v110_v38  ;;  %v673_v44 = vsub.s32 32, %v669_v39  ;;  %v125_v50 = vshll.u32 %v600_v48, %v110_v38 }
  0x9e   :  { %vm131_vm3 = vcmp.lt.s32.totalorder %v667_v37, 4  ;;  %v113_v57 = vshll.u32 %v602_v56, %v110_v38  ;;  %v116_v62 = vshll.u32 %v603_v58, %v110_v38  ;;  %v279_v1 = vshll.u32 %v599_v42, %v669_v39 }
  0x9f   :  { %v123_v49 = vshrl.u32 %v600_v48, %v111_v41  ;;  %v126_v52 = vshrl.u32 %v601_v51, %v111_v41  ;;  %v280_v53 = vshrl.u32 %v600_v48, %v673_v44  ;;  %v283_v54 = vshrl.u32 %v601_v51, %v673_v44 }
  0xa0   :  { %v114_v59 = vshrl.u32 %v603_v58, %v111_v41  ;;  %v117_v0 = vshrl.u32 %v604_v63, %v111_v41  ;;  %v119_v3 = vshll.u32 %v604_v63, %v110_v38  ;;  %v120_v4 = vshrl.u32 %v599_v42, %v111_v41 }
  0xa1   :  { %v124_v60 = vor.u32 %v123_v49, %v122_v43  ;;  %v127_v61 = vor.u32 %v126_v52, %v125_v50  ;;  %v282_v7 = vshll.u32 %v600_v48, %v669_v39  ;;  %vm128_vm4 = vcmp.lt.s32.totalorder %v667_v37, 1 }
  0xa2   :  { %v115_v2 = vor.u32 %v114_v59, %v113_v57  ;;  %v118_v8 = vor.u32 %v117_v0, %v116_v62  ;;  %v121_v11 = vor.u32 %v120_v4, %v119_v3  ;;  %v698_v15 = vor.u32 %v280_v53, %v279_v1 }
  0xa3   :  { %v137_v5 = vsel %vm131_vm3, %v124_v60, 920167782  ;;  %v141_v6 = vsel %vm131_vm3, %v127_v61, 1326507024  ;;  %v284_v16 = vor.u32 %v283_v54, %v282_v7  ;;  %vm130_vm5 = vcmp.lt.s32.totalorder %v667_v37, 3 }
  0xa4   :  { %v136_v18 = vsel %vm128_vm4, %v115_v2, %v118_v8  ;;  %vm129_vm6 = vcmp.lt.s32.totalorder %v667_v37, 2  ;;  %v138_v20 = vsel %vm130_vm5, %v121_v11, %v137_v5  ;;  %v140_v21 = vsel %vm128_vm4, %v118_v8, %v121_v11 }
  0xa5   :  { %v142_v22 = vsel %vm130_vm5, %v124_v60, %v141_v6  ;;  %v112_v23 = vshrl.u32 %v602_v56, %v111_v41  ;;  %v133_v24 = vsel %vm131_vm3, %v121_v11, 2102212464  ;;  %v139_v25 = vsel %vm129_vm6, %v136_v18, %v138_v20 }
  0xa6   :  { %v143_v26 = vsel %vm129_vm6, %v140_v21, %v142_v22  ;;  %vm288_vm7 = vcmp.lt.s32.totalorder %v694_v9, 4  ;;  %v169_v29 = vand.u32 65535, %v139_v25  ;;  %v170_v33 = vshrl.u32 %v139_v25, 16 }
  0xa7   :  { %v147_v27 = vand.u32 65535, %v143_v26  ;;  %v148_v28 = vshrl.u32 %v143_v26, 16  ;;  %v294_v30 = vsel %vm288_vm7, %v698_v15, 920167782  ;;  %v298_v31 = vsel %vm288_vm7, %v284_v16, 1326507024 }
  0xa8   :  { %v132_v32 = vsel %vm128_vm4, %v112_v23, %v115_v2  ;;  %v134_v34 = vsel %vm130_vm5, %v118_v8, %v133_v24  ;;  %v270_v40 = vshll.u32 %v602_v56, %v669_v39  ;;  %v172_v41 = vmul.u32 %v170_v33, %v676_v46 }
  0xa9   :  { %v150_v36 = vmul.u32 %v148_v28, %v676_v46  ;;  %v151_v38 = vmul.u32 %v147_v27, %v146_v14  ;;  %v173_v43 = vmul.u32 %v169_v29, %v146_v14  ;;  %v271_v45 = vshrl.u32 %v603_v58, %v673_v44 }
  0xaa   :  { %v273_v48 = vshll.u32 %v603_v58, %v669_v39  ;;  %v149_v49 = vmul.u32 %v147_v27, %v676_v46  ;;  %v152_v50 = vmul.u32 %v148_v28, %v146_v14  ;;  %v171_v52 = vmul.u32 %v169_v29, %v676_v46 }
  0xab   :  { %v153_v51 = vshll.u32 %v150_v36, 16  ;;  %v154_v53 = vshrl.u32 %v150_v36, 16  ;;  %v155_v54 = vshll.u32 %v151_v38, 16  ;;  %v174_v55 = vmul.u32 %v170_v33, %v146_v14 }
  0xac   :  { %v175_v57 = vshll.u32 %v172_v41, 16  ;;  %v177_v60 = vshll.u32 %v173_v43, 16  ;;  %v274_v61 = vshrl.u32 %v604_v63, %v673_v44  ;;  %v605_v62 = vmov 0  }
  0xad   :  { %vm157_vm8 = vc.u32 %v149_v49, %v153_v51  ;;  %v159_v59 = vadd.s32 %v153_v51, %v149_v49  ;;  %v738_v1 = vor.u32 %v271_v45, %v270_v40  ;;  %v156_v4 = vshrl.u32 %v151_v38, 16 }
  0xae   :  { %v158_v0 = vsel %vm157_vm8, 1, %v605_v62  ;;  %vm179_vm9 = vc.u32 %v171_v52, %v175_v57  ;;  %v181_v58 = vadd.s32 %v175_v57, %v171_v52  ;;  %v741_v3 = vor.u32 %v274_v61, %v273_v48 }
  0xaf   :  { %v160_v2 = vadd.s32 %v158_v0, %v152_v50  ;;  %vm161_vm10 = vc.u32 %v159_v59, %v155_v54  ;;  %v180_v46 = vsel %vm179_vm9, 1, %v605_v62  ;;  %v276_v11 = vshll.u32 %v604_v63, %v669_v39 }
  0xb0   :  { %v162_v5 = vsel %vm161_vm10, 1, %v605_v62  ;;  %v182_v6 = vadd.s32 %v180_v46, %v174_v55  ;;  %vm183_vm11 = vc.u32 %v181_v58, %v177_v60  ;;  %v277_v14 = vshrl.u32 %v599_v42, %v673_v44 }
  0xb1   :  { %v164_v7 = vadd.s32 %v162_v5, %v160_v2  ;;  %v184_v8 = vsel %vm183_vm11, 1, %v605_v62  ;;  %v176_v16 = vshrl.u32 %v172_v41, 16  ;;  %vm285_vm12 = vcmp.lt.s32.totalorder %v694_v9, 1 }
  0xb2   :  { %v186_v18 = vadd.s32 %v184_v8, %v182_v6  ;;  %vm287_vm13 = vcmp.lt.s32.totalorder %v694_v9, 3  ;;  %v278_v21 = vor.u32 %v277_v14, %v276_v11  ;;  %v293_v22 = vsel %vm285_vm12, %v738_v1, %v741_v3 }
  0xb3   :  { %v165_v20 = vadd.s32 %v164_v7, %v154_v53  ;;  %v299_v39 = vsel %vm287_vm13, %v698_v15, %v298_v31  ;;  %v178_v63 = vshrl.u32 %v173_v43, 16  ;;  %v758_v23 = vadd.s32 %v181_v58, %v177_v60 }
  0xb4   :  { %v187_v42 = vadd.s32 %v186_v18, %v176_v16  ;;  %vm286_vm14 = vcmp.lt.s32.totalorder %v694_v9, 2  ;;  %v295_v25 = vsel %vm287_vm13, %v278_v21, %v294_v30  ;;  %v297_v26 = vsel %vm285_vm12, %v741_v3, %v278_v21 }
  0xb5   :  { %v760_v24 = vadd.s32 %v165_v20, %v156_v4  ;;  %v135_v27 = vsel %vm129_vm6, %v132_v32, %v134_v34  ;;  %v296_v15 = vsel %vm286_vm14, %v293_v22, %v295_v25  ;;  %v300_v29 = vsel %vm286_vm14, %v297_v26, %v299_v39 }
  0xb6   :  { %v188_v28 = vadd.s32 %v187_v42, %v178_v63  ;;  %v302_v31 = vand.u32 65535, %v678_v47  ;;  %v303_v30 = vshrl.u32 %v678_v47, 16  ;;  %v304_v33 = vand.u32 65535, %v300_v29 }
  0xb7   :  { %vm191_vm15 = vc.u32 %v760_v24, %v758_v23  ;;  %v305_v38 = vshrl.u32 %v300_v29, 16  ;;  %v326_v40 = vand.u32 65535, %v296_v15  ;;  %v327_v37 = vshrl.u32 %v296_v15, 16 }
  0xb8   :  { %v192_v36 = vadd.s32 1, %v188_v28  ;;  %v189_v32 = vmul.u32 %v665_v35, %v135_v27  ;;  %v308_v43 = vmul.u32 %v304_v33, %v303_v30  ;;  %v306_v49 = vmul.u32 %v304_v33, %v302_v31 }
  0xb9   :  { %v307_v41 = vmul.u32 %v305_v38, %v302_v31  ;;  %v329_v48 = vmul.u32 %v327_v37, %v302_v31  ;;  %v330_v51 = vmul.u32 %v326_v40, %v303_v30  ;;  %v309_v53 = vmul.u32 %v305_v38, %v303_v30 }
  0xba   :  { %v193_v34 = vsel %vm191_vm15, %v192_v36, %v188_v28  ;;  %v328_v54 = vmul.u32 %v326_v40, %v302_v31  ;;  %v312_v57 = vshll.u32 %v308_v43, 16  ;;  %v331_v60 = vmul.u32 %v327_v37, %v303_v30 }
  0xbb   :  { %v194_v45 = vadd.s32 %v193_v34, %v189_v32  ;;  %v310_v50 = vshll.u32 %v307_v41, 16  ;;  %v332_v55 = vshll.u32 %v329_v48, 16  ;;  %v334_v2 = vshll.u32 %v330_v51, 16 }
  0xbc   :  { %v290_v7 = vsel %vm288_vm7, %v278_v21, 2102212464  ;;  %v311_v8 = vshrl.u32 %v307_v41, 16  ;;  %v269_v16 = vshrl.u32 %v602_v56, %v673_v44  ;;  %v313_v20 = vshrl.u32 %v308_v43, 16 }
  0xbd   :  { %v195_v52 = vadd.s32 536870912, %v194_v45  ;;  %vm314_vm0 = vc.u32 %v306_v49, %v310_v50  ;;  %v316_v59 = vadd.s32 %v310_v50, %v306_v49  ;;  %vm336_vm1 = vc.u32 %v328_v54, %v332_v55 }
  0xbe   :  { %v315_v35 = vsel %vm314_vm0, 1, %v605_v62  ;;  %v338_v0 = vadd.s32 %v332_v55, %v328_v54  ;;  %v337_v46 = vsel %vm336_vm1, 1, %v605_v62  ;;  %v333_v39 = vshrl.u32 %v329_v48, 16 }
  0xbf   :  { %v779_v61 = vshrl.u32 %v195_v52, 30  ;;  %v317_v58 = vadd.s32 %v315_v35, %v309_v53  ;;  %vm318_vm2 = vc.u32 %v316_v59, %v312_v57  ;;  %v339_v6 = vadd.s32 %v337_v46, %v331_v60 }
  0xc0   :  { %v319_v5 = vsel %vm318_vm2, 1, %v605_v62  ;;  %vm340_vm3 = vc.u32 %v338_v0, %v334_v2  ;;  %v289_v25 = vsel %vm285_vm12, %v269_v16, %v738_v1  ;;  %v291_v21 = vsel %vm287_vm13, %v741_v3, %v290_v7 }
  0xc1   :  { %v197_v4 = vshll.u32 %v779_v61, 30  ;;  %v321_v11 = vadd.s32 %v319_v5, %v317_v58  ;;  %v341_v18 = vsel %vm340_vm3, 1, %v605_v62  ;;  %v335_v27 = vshrl.u32 %v330_v51, 16 }
  0xc2   :  { %v343_v63 = vadd.s32 %v341_v18, %v339_v6  ;;  %v342_v56 = vadd.s32 %v338_v0, %v334_v2  ;;  %v292_v15 = vsel %vm286_vm14, %v289_v25, %v291_v21  ;;  %v190_v3 = vadd.s32 %v758_v23, %v760_v24 }
  0xc3   :  { %v198_v14 = vsub.s32 %v194_v45, %v197_v4  ;;  %v322_v22 = vadd.s32 %v321_v11, %v311_v8  ;;  %v346_v33 = vmul.u32 %v678_v47, %v292_v15  ;;  %vm98_vm8 = vcmp.lt.s32.totalorder %v652_v12, 0 }
  0xc4   :  { %v344_v28 = vadd.s32 %v343_v63, %v333_v39  ;;  %vm807_vm9 = vcmp.le.f32.partialorder %v96_v17, 0.7853982  ;;  %vm255_vm11 = vcmp.lt.s32.totalorder %v655_v13, 0  ;;  %vm825_vm12 = vcmp.le.f32.partialorder %v253_v19, 0.7853982 }
  0xc5   :  { %vm199_vm4 = vcmp.lt.s32.totalorder %v198_v14, 0  ;;  %v200_v42 = vsub.s32 0, %v198_v14  ;;  %v323_v26 = vadd.s32 %v322_v22, %v313_v20  ;;  %v220_v22 = vsub.s32 4, %v779_v61 }
  0xc6   :  { %v345_v29 = vadd.s32 %v344_v28, %v335_v27  ;;  %vm239_vm0 = vweird.f32 %v652_v12 }
  0xc7   :  { %v201_v44 = vsel %vm199_vm4, %v200_v42, %v198_v14  ;;  %vm348_vm5 = vc.u32 %v323_v26, %v342_v56  ;;  %v347_v4 = vadd.s32 %v342_v56, %v323_v26  ;;  %v221_v26 = vsel %vm98_vm8, %v220_v22, %v779_v61 }
  0xc8   :  { %v202_v62 = vclz %v201_v44  ;;  %v349_v30 = vadd.s32 1, %v345_v29  ;;  %v223_v56 = vsel %vm807_vm9, 0, %v221_v26  ;;  %vm396_vm4 = vweird.f32 %v655_v13 }
  0xc9   :  { %v240_v61 = vadd.s32 3, %v223_v56 }
  0xca   :  { %v470_v31 = vadd.s32 4294967294, %v202_v62  ;;  %v350_v1 = vsel %vm348_vm5, %v349_v30, %v345_v29 }
  0xcb   :  { %v351_v38 = vadd.s32 %v350_v1, %v346_v33 }
  0xcc   :  { %vm471_vm6 = vcmp.lt.s32.totalorder %v470_v31, 0 }
  0xcd   :  { %v205_v36 = vsel %vm471_vm6, 0, %v470_v31  ;;  %v352_v32 = vadd.s32 536870912, %v351_v38 }
  0xce   :  { %v206_v40 = vsub.s32 32, %v205_v36  ;;  %v210_v37 = vsub.s32 4294967266, %v205_v36  ;;  %v207_v34 = vshll.u32 %v198_v14, %v205_v36 }
  0xcf   :  { %v801_v43 = vshrl.u32 %v352_v32, 30 }
  0xd0   :  { %v208_v41 = vshrl.u32 %v190_v3, %v206_v40  ;;  %v211_v9 = vadd.s32 127, %v210_v37  ;;  %v241_v37 = vand.u32 3, %v240_v61 }
  0xd1   :  { %v354_v49 = vshll.u32 %v801_v43, 30  ;;  %v377_v32 = vsub.s32 4, %v801_v43 }
  0xd2   :  { %v209_v45 = vor.u32 %v208_v41, %v207_v34  ;;  %v212_v48 = vshll.u32 %v211_v9, 23  ;;  %vm243_vm13 = vcmp.eq.s32.totalorder %v241_v37, 0  ;;  %vm242_vm14 = vcmp.lt.s32.totalorder %v241_v37, 2 }
  0xd3   :  { %v355_v50 = vsub.s32 %v351_v38, %v354_v49  ;;  %v378_v49 = vsel %vm255_vm11, %v377_v32, %v801_v43  ;;  %vm246_vm15 = vcmp.eq.s32.totalorder %v241_v37, 2 }
  0xd4   :  { %v213_v47 = vor.u32 4788187, %v212_v48  ;;  %v216_v52 = vcvt.s32.f32 %v209_v45 }
  0xd5   :  { %vm356_vm7 = vcmp.lt.s32.totalorder %v355_v50, 0  ;;  %v357_v53 = vsub.s32 0, %v355_v50 }
  0xd6   :  { %v214_v51 = vand.u32 2147483647, %v213_v47 }
  0xd7   :  { %v358_v23 = vsel %vm356_vm7, %v357_v53, %v355_v50  ;;  %v380_v53 = vsel %vm825_vm12, 0, %v378_v49 }
  0xd8   :  { %v217_v54 = vmul.f32 %v216_v52, %v214_v51  ;;  %v359_v55 = vclz %v358_v23 }
  0xda   :  { %v218_v24 = vxor.u32 2147483648, %v217_v54  ;;  %v473_v60 = vadd.s32 4294967294, %v359_v55 }
  0xdc   :  { %v219_v59 = vsel %vm98_vm8, %v218_v24, %v217_v54  ;;  %vm474_vm10 = vcmp.lt.s32.totalorder %v473_v60, 0 }
  0xdd   :  { %v222_v35 = vsel %vm807_vm9, %v652_v12, %v219_v59  ;;  %v362_v58 = vsel %vm474_vm10, 0, %v473_v60  ;;  %v397_v59 = vand.u32 3, %v380_v53 }
  0xde   :  { %v224_v0 = vmul.f32 %v222_v35, %v222_v35  ;;  %v363_v5 = vsub.s32 32, %v362_v58  ;;  %v367_v6 = vsub.s32 4294967266, %v362_v58  ;;  %v364_v11 = vshll.u32 %v355_v50, %v362_v58 }
  0xdf   :  { %vm399_vm1 = vcmp.eq.s32.totalorder %v397_v59, 0  ;;  %vm402_vm2 = vcmp.eq.s32.totalorder %v397_v59, 2  ;;  %vm398_vm3 = vcmp.lt.s32.totalorder %v397_v59, 2 }
  0xe0   :  { %v225_v2 = vmul.f32 -0.001358992, %v224_v0  ;;  %v232_v46 = vmul.f32 -0.00019511016, %v224_v0  ;;  %v365_v7 = vshrl.u32 %v347_v4, %v363_v5  ;;  %v368_v14 = vadd.s32 127, %v367_v6 }
  0xe2   :  { %v233_v17 = vadd.f32 0.008332121, %v232_v46  ;;  %v226_v8 = vadd.f32 0.041655596, %v225_v2  ;;  %v366_v18 = vor.u32 %v365_v7, %v364_v11  ;;  %v369_v20 = vshll.u32 %v368_v14, 23 }
  0xe3   :  { %v489_v7 = vld [vmem:[%s853_s4] ss:$0 sm:$0xff] }
  0xe4   :  { %v234_v16 = vmul.f32 %v233_v17, %v224_v0  ;;  %v227_v63 = vmul.f32 %v226_v8, %v224_v0  ;;  %v370_v42 = vor.u32 4788187, %v369_v20  ;;  %v373_v27 = vcvt.s32.f32 %v366_v18  ;;  %v491_v17 = vpop.eup %490 }
  0xe6   :  { %v235_v39 = vadd.f32 -0.16666654, %v234_v16  ;;  %v371_v21 = vand.u32 2147483647, %v370_v42  ;;  %v228_v28 = vadd.f32 -0.4999988, %v227_v63 }
  0xe8   :  { %v236_v25 = vmul.f32 %v235_v39, %v224_v0  ;;  %v374_v44 = vmul.f32 %v373_v27, %v371_v21  ;;  %v229_v29 = vmul.f32 %v228_v28, %v224_v0 }
  0xea   :  { %v237_v62 = vadd.f32 1.0, %v236_v25  ;;  %v375_v15 = vxor.u32 2147483648, %v374_v44  ;;  %v230_v38 = vadd.f32 1.0, %v229_v29 }
  0xec   :  { %v376_v30 = vsel %vm255_vm11, %v375_v15, %v374_v44  ;;  %v238_v1 = vmul.f32 %v237_v62, %v222_v35  ;;  %v247_v9 = vxor.u32 2147483648, %v230_v38 }
  0xed   :  { %v379_v33 = vsel %vm825_vm12, %v655_v13, %v376_v30 }
  0xee   :  { %v381_v36 = vmul.f32 %v379_v33, %v379_v33  ;;  %v244_v19 = vxor.u32 2147483648, %v238_v1  ;;  %v248_v52 = vsel %vm246_vm15, %v247_v9, %v238_v1 }
  0xf0   :  { %v382_v3 = vmul.f32 -0.001358992, %v381_v36  ;;  %v389_v40 = vmul.f32 -0.00019511016, %v381_v36  ;;  %v245_v47 = vsel %vm243_vm13, %v230_v38, %v244_v19 }
  0xf1   :  { %v249_v24 = vsel %vm242_vm14, %v245_v47, %v248_v52 }
  0xf2   :  { %v383_v34 = vadd.f32 0.041655596, %v382_v3  ;;  %v390_v41 = vadd.f32 0.008332121, %v389_v40  ;;  %v250_v60 = vsel %vm239_vm0, nan, %v249_v24 }
  0xf3   :  { %v251_v58 = vmul.f32 0.1, %v250_v60 }
  0xf4   :  { %v384_v45 = vmul.f32 %v383_v34, %v381_v36  ;;  %v391_v48 = vmul.f32 %v390_v41, %v381_v36 }
  0xf6   :  { %v385_v50 = vadd.f32 -0.4999988, %v384_v45  ;;  %v392_v51 = vadd.f32 -0.16666654, %v391_v48 }
  0xf8   :  { %v386_v54 = vmul.f32 %v385_v50, %v381_v36  ;;  %v393_v23 = vmul.f32 %v392_v51, %v381_v36 }
  0xfa   :  { %v387_v55 = vadd.f32 1.0, %v386_v54  ;;  %v394_v57 = vadd.f32 1.0, %v393_v23 }
  0xfc   :  { %v395_v35 = vmul.f32 %v394_v57, %v379_v33  ;;  %v403_v43 = vxor.u32 2147483648, %v387_v55 }
  0xfe   :  { %v400_v0 = vxor.u32 2147483648, %v395_v35  ;;  %v404_v46 = vsel %vm402_vm2, %v403_v43, %v395_v35 }
 0x100   :  { %v401_v2 = vsel %vm399_vm1, %v387_v55, %v400_v0 }
 0x101   :  { %v405_v4 = vsel %vm398_vm3, %v401_v2, %v404_v46 }
 0x102   :  { %v406_v5 = vsel %vm396_vm4, nan, %v405_v4 }
 0x103   :  { %v407_v6 = vmul.f32 %v406_v5, %v251_v58 }
 0x105   :  { %v408_v12 = vadd.f32 %v491_v17, %v407_v6 }
 0x107   :  { %445 = vmatmul.f32.vlgmr.msra.gmra.mxu1 %v408_v12 }
 0x184   :  { %v446_v10 = vpop.f32.mrf.mxu1 }
 0x185   :  { %v447_v8 = vadd.f32 %v489_v7, %v446_v10 }
 0x187   :  { %449 = vst [vmem:[#allocation8] sm:$0xff] %v447_v8 }
 0x188   :  { %460 = dma.vmem_to_hbm [thread:$0]  %s456_s11, 128, %s458_s14, [#allocation4]  }
 0x189   :  { %592 = dma.done.wait [#allocation4], 128  }
 0x18a   :  { %593 = vsyncadd [#allocation4], 4294967168 }
 0x18b   :  { %465 = vsyncpa [#allocation3], 1 }
 0x18c   :  { %466 = vsyncpa [#allocation6], 1 }
 0x18d   :  { %467 = vsyncpa [#allocation4], 1 }

</bundles_post_ra>
